<compile_context>
chip_gen: v7x
topology: tpu7x:2x2x1
jax: 0.10.0
libtpu: 0.0.40
codegen_flags: <defaults>
</compile_context>

<pallas_src>
import jax
import jax.numpy as jnp
from jax import lax
from jax.experimental import pallas as pl
from jax.experimental.pallas import tpu as pltpu

_NEG_BIG = -1e30  # finite large-negative init for the online max: exp underflows to 0


def _round_up(x, m):
    return ((x + m - 1) // m) * m


def _cdiv(a, b):
    return -(-a // b)


def _vmem_limits():
    """Per-generation VMEM budgets (conservative v7x fallback: 64 MiB per TC)."""
    vmem_cap = 64 * 1024 * 1024
    try:
        info = pltpu.get_tpu_info()
        cap = int(getattr(info, "vmem_capacity_bytes", 0))
        if cap > 0:
            vmem_cap = cap
    except Exception:
        pass
    # One logits buffer (double-buffered by the pipeline => x2) must leave headroom
    # for f32 chunk temporaries + label/output buffers.
    tile_budget = min(16 * 1024 * 1024, vmem_cap // 4)
    vmem_limit = min(vmem_cap * 3 // 4, 96 * 1024 * 1024)
    return tile_budget, vmem_limit


def _make_ce_kernel(v, v_chunk, tile_n):
    """Kernel factory: per-row masked NLL for one row tile of [N, V] logits."""
    n_full = v // v_chunk           # number of full, 128-aligned chunks
    rem = v - n_full * v_chunk      # ragged tail width (real columns only, no padding)

    def kernel(logits_ref, labels_ref, nll_ref):
        labels = labels_ref[...]                                   # [tile_n, 1] int32

        if n_full == 0:
            # Whole vocabulary fits in one (possibly ragged) chunk.
            chunk = logits_ref[...].astype(jnp.float32)            # [tile_n, v]
            col = jax.lax.broadcasted_iota(jnp.int32, (tile_n, v), 1)
            m = jnp.max(chunk, axis=-1, keepdims=True)
            s = jnp.sum(jnp.exp(chunk - m), axis=-1, keepdims=True)
            t = jnp.sum(jnp.where(col == labels, chunk, 0.0),
                        axis=-1, keepdims=True)
        else:
            # Iota hoisted out of the loop (JAX does not CSE broadcast_in_dim); the
            # per-chunk offset is folded into the cheap [tile_n,1] label subtract.
            col = jax.lax.broadcasted_iota(jnp.int32, (tile_n, v_chunk), 1)

            def chunk_stats(c, carry):
                m, s, t = carry
                start = pl.multiple_of(c * v_chunk, 128)
                chunk = logits_ref[:, pl.ds(start, v_chunk)].astype(jnp.float32)
                m_new = jnp.maximum(m, jnp.max(chunk, axis=-1, keepdims=True))
                s_new = (s * jnp.exp(m - m_new)
                         + jnp.sum(jnp.exp(chunk - m_new), axis=-1, keepdims=True))
                t_new = t + jnp.sum(
                    jnp.where(col == labels - c * v_chunk, chunk, 0.0),
                    axis=-1, keepdims=True)
                return m_new, s_new, t_new

            init = (jnp.full((tile_n, 1), _NEG_BIG, jnp.float32),
                    jnp.zeros((tile_n, 1), jnp.float32),
                    jnp.zeros((tile_n, 1), jnp.float32))
            m, s, t = lax.fori_loop(0, n_full, chunk_stats, init,
                                    unroll=n_full <= 4)

            if rem:
                # Peeled ragged tail: only real columns are loaded, so no pad mask.
                start = n_full * v_chunk                            # static, 128-aligned
                chunk = logits_ref[:, pl.ds(start, rem)].astype(jnp.float32)
                col_t = jax.lax.broadcasted_iota(jnp.int32, (tile_n, rem), 1)
                m_new = jnp.maximum(m, jnp.max(chunk, axis=-1, keepdims=True))
                s = (s * jnp.exp(m - m_new)
                     + jnp.sum(jnp.exp(chunk - m_new), axis=-1, keepdims=True))
                t = t + jnp.sum(jnp.where(col_t == labels - start, chunk, 0.0),
                                axis=-1, keepdims=True)
                m = m_new

        lse = m + jnp.log(s)                                       # [tile_n, 1]
        valid = labels != -1
        # jnp.where is a lane select: NaN/garbage from out-of-bounds rows of the last
        # (uneven) row tile cannot propagate because those rows carry label == -1.
        nll_ref[...] = jnp.where(valid, lse - t, 0.0)

    return kernel


def _cross_entropy_ignore_neg1_pallas(logits, labels, *,
                                      max_tile_rows=256,
                                      v_chunk=2048):
    """Mean cross-entropy over rows whose label != -1 (torch CrossEntropyLoss
    with ignore_index=-1, reduction='mean'), computed with a row-tiled Pallas kernel.
    The [N, V] logits are read in place — never padded or copied."""
    n, v = logits.shape
    itemsize = jnp.dtype(logits.dtype).itemsize
    v_chunk = max(128, (v_chunk // 128) * 128)        # keep chunk starts 128-aligned

    tile_budget, vmem_limit = _vmem_limits()

    # --- row tile sized to the per-buffer VMEM budget (v7x-safe: <=16 MiB/buffer) ---
    rows_fit = max(8, (tile_budget // max(v * itemsize, 1)) // 8 * 8)
    tile_n = min(max_tile_rows, rows_fit, _round_up(n, 8))
    num_tiles = _cdiv(n, tile_n)
    # Megacore: prefer >= 2 row tiles so both TensorCores get work on v7x.
    if num_tiles < 2 and n > 8:
        tile_n = max(8, _round_up(_cdiv(n, 2), 8))
        num_tiles = _cdiv(n, tile_n)
    n_pad = num_tiles * tile_n

    # Only the tiny label column is padded (with -1); logits are NOT touched.
    labels2d = labels.reshape(-1, 1).astype(jnp.int32)
    if n_pad != n:
        labels2d = jnp.pad(labels2d, ((0, n_pad - n), (0, 0)), constant_values=-1)

    kernel = _make_ce_kernel(v, v_chunk, tile_n)

    cost = pl.CostEstimate(
        flops=int(5 * n * v),
        transcendentals=int(n * v),
        bytes_accessed=int(n * v * itemsize + 2 * n_pad * 4),
    )

    nll = pl.pallas_call(
        kernel,
        grid=(num_tiles,),
        in_specs=[
            pl.BlockSpec((tile_n, v), lambda i: (i, 0)),   # logits, native dtype
            pl.BlockSpec((tile_n, 1), lambda i: (i, 0)),   # labels (padded with -1)
        ],
        out_specs=pl.BlockSpec((tile_n, 1), lambda i: (i, 0)),   # masked per-row NLL
        out_shape=jax.ShapeDtypeStruct((n_pad, 1), jnp.float32),
        compiler_params=pltpu.CompilerParams(
            dimension_semantics=("parallel",),             # row tiles independent
            vmem_limit_bytes=vmem_limit,
        ),
        cost_estimate=cost,
    )(logits, labels2d)

    # Validity count comes straight from the labels in plain JAX (exact denominator);
    # NaN when every label is -1, matching torch's mean-over-zero behavior.
    valid_count = jnp.sum((labels.astype(jnp.int32) != -1).astype(jnp.float32))
    return jnp.sum(nll) / valid_count


def _cross_entropy_ignore_neg1_jax(logits, labels):
    """Plain-JAX CE with ignore_index=-1 (tiny next-sentence head + reference impl)."""
    logits = logits.astype(jnp.float32)
    labels = labels.astype(jnp.int32)
    m = jnp.max(logits, axis=-1, keepdims=True)
    lse = (m + jnp.log(jnp.sum(jnp.exp(logits - m), axis=-1, keepdims=True)))[:, 0]
    valid = labels != -1
    safe = jnp.where(valid, labels, 0)
    tgt = jnp.take_along_axis(logits, safe[:, None], axis=-1)[:, 0]
    nll = jnp.where(valid, lse - tgt, 0.0)
    return jnp.sum(nll) / jnp.sum(valid.astype(jnp.float32))


def bert_pretraining_criterion(prediction_scores, seq_relationship_score,
                               masked_lm_labels, next_sentence_labels,
                               vocab_size):
    # TODO(synk): sequence_output_is_dense=True path (dynamic-shape label compaction)
    # not implemented; this covers the default dense=False branch.
    # NOTE: the MLM kernel reads prediction_scores in its native dtype — feed bf16
    # from the upstream matmul epilogue to halve HBM traffic (do not cast here).
    masked_lm_loss = _cross_entropy_ignore_neg1_pallas(
        prediction_scores.reshape(-1, vocab_size),
        masked_lm_labels.reshape(-1))
    # Next-sentence head is [batch, 2]: stays in plain JAX (a kernel launch costs more
    # than the compute).
    next_sentence_loss = _cross_entropy_ignore_neg1_jax(
        seq_relationship_score.reshape(-1, 2),
        next_sentence_labels.reshape(-1))
    return masked_lm_loss + next_sentence_loss


if __name__ == "__main__":
    key = jax.random.PRNGKey(0)
    batch, seq, vocab = 2, 8, 32

    k1, k2, k3, k4, k5, k6, k7 = jax.random.split(key, 7)
    prediction_scores = jax.random.normal(k1, (batch, seq, vocab), jnp.float32)
    seq_relationship_score = jax.random.normal(k2, (batch, 2), jnp.float32)

    mlm_labels = jax.random.randint(k3, (batch, seq), 0, vocab, jnp.int32)
    keep = jax.random.bernoulli(k4, 0.5, (batch, seq))          # ~half ignored (-1)
    masked_lm_labels = jnp.where(keep, mlm_labels, jnp.int32(-1))
    next_sentence_labels = jax.random.randint(k5, (batch,), 0, 2, jnp.int32)

    total_loss = bert_pretraining_criterion(
        prediction_scores, seq_relationship_score,
        masked_lm_labels, next_sentence_labels, vocab)
    total_loss = jax.block_until_ready(total_loss)

    # pure-JAX reference check (single-chunk path, 2 row tiles)
    ref = (_cross_entropy_ignore_neg1_jax(prediction_scores.reshape(-1, vocab),
                                          masked_lm_labels.reshape(-1))
           + _cross_entropy_ignore_neg1_jax(seq_relationship_score.reshape(-1, 2),
                                            next_sentence_labels.reshape(-1)))
    ref = jax.block_until_ready(ref)
    assert jnp.isfinite(total_loss)
    assert jnp.allclose(total_loss, ref, rtol=1e-3, atol=1e-3), (total_loss, ref)

    # second small check exercising the multi-chunk + ragged-tail kernel path
    vocab2 = 300
    logits2 = jax.random.normal(k6, (batch * seq, vocab2), jnp.float32)
    lbl2 = jax.random.randint(k7, (batch * seq,), 0, vocab2, jnp.int32)
    lbl2 = jnp.where(jax.random.bernoulli(k4, 0.5, (batch * seq,)), lbl2, -1)
    ce_pallas = jax.block_until_ready(
        _cross_entropy_ignore_neg1_pallas(logits2, lbl2, v_chunk=128))
    ce_ref = jax.block_until_ready(_cross_entropy_ignore_neg1_jax(logits2, lbl2))
    assert jnp.allclose(ce_pallas, ce_ref, rtol=1e-3, atol=1e-3), (ce_pallas, ce_ref)

    print("KERNEL_OK")
</pallas_src>

<mosaic_0001>
module attributes {stable_mosaic.version = 11 : i64} {
  func.func @kernel(%arg0: i32, %arg1: memref<8x32xf32, #tpu.memory_space<vmem>>, %arg2: memref<8x1xi32, #tpu.memory_space<vmem>>, %arg3: memref<8x1xf32, #tpu.memory_space<vmem>>) attributes {dimension_semantics = [#tpu.dimension_semantics<parallel>], iteration_bounds = array<i64: 2>, scalar_prefetch = 0 : i64, scratch_operands = 0 : i64, tpu.core_type = #tpu.core_type<tc>, window_params = [{transform_indices = @transform_0, window_bounds = array<i64: 8, 32>}, {transform_indices = @transform_1, window_bounds = array<i64: 8, 1>}, {transform_indices = @transform_2, window_bounds = array<i64: 8, 1>}]} {
    %c0 = arith.constant 0 : index
    %c0_0 = arith.constant 0 : index
    %0 = vector.load %arg2[%c0, %c0_0] : memref<8x1xi32, #tpu.memory_space<vmem>>, vector<8x1xi32>
    %c0_1 = arith.constant 0 : index
    %c0_2 = arith.constant 0 : index
    %1 = vector.load %arg1[%c0_1, %c0_2] : memref<8x32xf32, #tpu.memory_space<vmem>>, vector<8x32xf32>
    %2 = tpu.iota {dimensions = array<i32: 1>} : vector<8x32xi32>
    %cst = arith.constant dense<0xFF800000> : vector<8xf32>
    %3 = vector.multi_reduction <maximumf>, %1, %cst [1] : vector<8x32xf32> to vector<8xf32>
    %4 = vector.shape_cast %3 : vector<8xf32> to vector<8x1xf32>
    %5 = vector.broadcast %4 : vector<8x1xf32> to vector<8x32xf32>
    %6 = arith.subf %1, %5 : vector<8x32xf32>
    %7 = math.exp %6 : vector<8x32xf32>
    %cst_3 = arith.constant dense<0.000000e+00> : vector<8xf32>
    %8 = vector.multi_reduction <add>, %7, %cst_3 [1] : vector<8x32xf32> to vector<8xf32>
    %9 = vector.shape_cast %8 : vector<8xf32> to vector<8x1xf32>
    %10 = vector.broadcast %0 : vector<8x1xi32> to vector<8x32xi32>
    %11 = arith.cmpi eq, %2, %10 : vector<8x32xi32>
    %cst_4 = arith.constant 0.000000e+00 : f32
    %12 = vector.broadcast %cst_4 : f32 to vector<8x32xf32>
    %13 = arith.select %11, %1, %12 : vector<8x32xi1>, vector<8x32xf32>
    %cst_5 = arith.constant dense<0.000000e+00> : vector<8xf32>
    %14 = vector.multi_reduction <add>, %13, %cst_5 [1] : vector<8x32xf32> to vector<8xf32>
    %15 = vector.shape_cast %14 : vector<8xf32> to vector<8x1xf32>
    %16 = math.log %9 : vector<8x1xf32>
    %17 = arith.addf %4, %16 : vector<8x1xf32>
    %c-1_i32 = arith.constant -1 : i32
    %18 = vector.broadcast %c-1_i32 : i32 to vector<8x1xi32>
    %19 = arith.cmpi ne, %0, %18 : vector<8x1xi32>
    %20 = arith.subf %17, %15 : vector<8x1xf32>
    %cst_6 = arith.constant 0.000000e+00 : f32
    %21 = vector.broadcast %cst_6 : f32 to vector<8x1xf32>
    %22 = arith.select %19, %20, %21 : vector<8x1xi1>, vector<8x1xf32>
    %c0_7 = arith.constant 0 : index
    %c0_8 = arith.constant 0 : index
    %23 = vector.load %arg3[%c0_7, %c0_8] : memref<8x1xf32, #tpu.memory_space<vmem>>, vector<8x1xf32>
    tpu.vector_store %arg3[%c0_7, %c0_8], %22 {strides = array<i32>} : memref<8x1xf32, #tpu.memory_space<vmem>>, vector<8x1xf32>,
    return
  }
  func.func @transform_0(%arg0: i32) -> (i32, i32) {
    %c0_i32 = arith.constant 0 : i32
    %c0_i32_0 = arith.constant 0 : i32
    return %arg0, %c0_i32 : i32, i32
  }
  func.func @transform_1(%arg0: i32) -> (i32, i32) {
    %c0_i32 = arith.constant 0 : i32
    %c0_i32_0 = arith.constant 0 : i32
    return %arg0, %c0_i32 : i32, i32
  }
  func.func @transform_2(%arg0: i32) -> (i32, i32) {
    %c0_i32 = arith.constant 0 : i32
    %c0_i32_0 = arith.constant 0 : i32
    return %arg0, %c0_i32 : i32, i32
  }
}

</mosaic_0001>

<bundles_post_ra>
// kernel: tpu_custom_call.1
= control target key start
LH: loop header
LB: loop body
LE: loop exit
PB: predicated region body
PF: predicated region fallthrough
CT: control target
= control target key end

     0   :  { %s299_s9 = smov 0   ;;  %s327_s0 = inlined_call_operand.vmem [shape: f32[16,32], index: 0, kind: input, shape index: {}]   ;;  %s328_s1 = inlined_call_operand.vmem [shape: s32[16,1], index: 1, kind: input, shape index: {}]   ;;  %s329_s2 = inlined_call_operand.vmem [shape: f32[16,1], index: 2, kind: output, shape index: {}]  }
   0x1 LB: > { %s251_s10 = sadd.s32 4294967295, %s281_s9   ;;  %p255_p0 = scmp.ge.s32.totalorder %s281_s9, 1  ;;  %s281_s9 = sphi %s299_s9, %s12_s9  }
   0x2   : > { %p120_p1 = scmp.lt.s32.totalorder %s281_s9, 3 }
   0x4   : > { %p121_p2 = pnand %p255_p0, %p120_p1 }
   0x5   : > { %p144_p3 = scmp.lt.s32.totalorder (!%p121_p2), %s251_s10, 1  ;;  %v283_v0 = vmov (!%p121_p2), 0   ;;  %vm160_vm0 = vcmask (!%p121_p2), 261120   ;;  %v158_v7 = vlaneseq (!%p121_p2)  ;;  %vm184_vm3 = vcmask (!%p121_p2), 7168  }
   0x6   : > { %124 = sbr.rel (%p121_p2) target bundleno = 337 (0x151), region = 28  ;;  %270 = vset.pattern.permute.xlu0 (!%p121_p2), %v283_v0 }
   0x7   : > { %v159_v8 = vand.u32 (!%p121_p2), 127, %v158_v7 }
   0xd   : > { %s331_s10 = smov (!%p144_p3, %s251_s10), 1 }
   0xe   : > { %s307_s11 = sshll.u32 %s331_s10, 3 }
   0xf   : > { %s147_s14 = scalar_lea.vmem %s327_s0, %s307_s11  ;;  %s151_s17 = scalar_lea.vmem %s328_s1, %s307_s11 }
  0x10   : > { %v157_v1 = vld [vmem:[%s147_s14] sm:$0xff]  ;;  %s155_s20 = scalar_lea.vmem %s329_s2, %s307_s11 }
  0x11   : > { %v161_v2 = vsel %vm160_vm0, %v157_v1, -inf  ;;  %v156_v3 = vld [vmem:[%s151_s17] sm:$0xff] }
  0x12   : > { %162 = vmax.xlane.f32.xlu0 %v161_v2  ;;  %vm181_vm2 = vcmp.ne.s32.totalorder %v156_v3, 4294967295 }
  0x28   : > { %171 = vperm.xlu0 %270, %v156_v3  }
  0x9f   : > { %v163_v4 = vpop.xlane.xlu0 %162 }
  0xa0   : > { %v164_v5 = vsub.f32 %v157_v1, %v163_v4 }
  0xa2   : > { %v165_v6 = vmul.f32 1.442695, %v164_v5 }
  0xa4   : > { %271 = vpow2.f32 %v165_v6 }
  0xa7   : > { %v172_v9 = vpop.permute.xlu0 %171 }
  0xa8   : > { %vm173_vm1 = vcmp.eq.s32.totalorder %v159_v8, %v172_v9 }
  0xa9   : > { %v174_v11 = vsel %vm173_vm1, %v157_v1, 0.0 }
  0xaa   : > { %v175_v13 = vsel %vm160_vm0, %v174_v11, 0.0 }
  0xae   : > { %v272_v10 = vpop.eup %271 }
  0xaf   : > { %v167_v12 = vsel %vm160_vm0, %v272_v10, 0.0 }
  0xb0   : > { %168 = vadd.xlane.f32.xlu1 %v167_v12 }
  0xb4   : > { %176 = vadd.xlane.f32.xlu1 %v175_v13 }
 0x13d   : > { %v169_v14 = vpop.xlane.xlu1 %168 }
 0x13e   : > { %273 = vlog2.f32 %v169_v14 }
 0x141   : > { %v177_v17 = vpop.xlane.xlu1 %176 }
 0x148   : > { %v274_v15 = vpop.eup %273 }
 0x149   : > { %v179_v16 = vmul.f32 0.6931472, %v274_v15 }
 0x14b   : > { %v180_v18 = vadd.f32 %v179_v16, %v163_v4 }
 0x14d   : > { %v182_v19 = vsub.f32 %v180_v18, %v177_v17 }
 0x14f   : > { %v183_v20 = vsel %vm181_vm2, %v182_v19, 0.0 }
 0x150   : > { %185 = vst.msk [vmem:[%s155_s20] sm:$0xff] %vm184_vm3, %v183_v20 }
 0x151 PF: > { %s12_s9 = sadd.s32 1, %s281_s9  }
 0x152   : > { %p9_p4 = scmp.ge.s32.totalorder %s12_s9, 4  }
 0x154   :  { %11 = sbr.rel (!%p9_p4) target bundleno = 1 (0x1), region = 61 }

</bundles_post_ra>
